<compile_context>
chip_gen: v6e
topology: v6e:2x2x1
jax: 0.10.0
libtpu: 0.0.40
codegen_flags: <defaults>
</compile_context>

<pallas_src>
import jax
import jax.numpy as jnp
from jax.experimental import pallas as pl
from jax.experimental.pallas import tpu as pltpu


# ---------------- configuration (consistent with the module) ----------------
B = 2            # batch
N = 8            # sequence length
DIM = 32         # model dim
HEADS = 8
HEAD_DIM = DIM // HEADS
INIT_SCALE = 4
SCALE = DIM ** (-0.5)    # NOTE: module scales by full dim, not head dim (kept).

ROWS = B * N                     # 16 flattened (batch, seq) rows
BIG = HEADS * ROWS               # 128 = (head, row) pairs, head-major
NEG_BIG = -1e30                  # additive mask value (exp underflows to 0)


# ---------------- Pallas kernel ----------------------------------------------
def attention_kernel(x_ref, wqkv_ref, wout_ref, bout_ref, hmask_ref, bias_ref,
                     o_ref):
    f32 = jnp.float32
    x = x_ref[...]                                                  # (16, 32)

    # -- fused QKV projection: one (16,32) @ (32,96) MXU op -------------------
    qkv = jnp.dot(x, wqkv_ref[...], preferred_element_type=f32)    # (16, 96)
    q = qkv[:, 0 * DIM:1 * DIM]                                    # (16, 32)
    k = qkv[:, 1 * DIM:2 * DIM]                                    # (16, 32)
    v = qkv[:, 2 * DIM:3 * DIM]                                    # (16, 32)

    head_mask = hmask_ref[...]                                     # (128, 32)

    # -- all heads & batches in one shot --------------------------------------
    # Row space r in [0,128): h = r // 16 (head), g = r % 16 (flat b*N+i row).
    # q replicated per head via a pure sublane broadcast (no MXU, no iota);
    # other-head columns are zeroed by the precomputed 0/1 head mask.
    q_big = (jnp.broadcast_to(q[None], (HEADS, ROWS, DIM))
                .reshape(BIG, DIM) * head_mask)                    # (128, 32)

    # scores in the lane-dense (key, head*row) orientation: 2 full vregs.
    # s[j, r] = <k[j], q_big[r]>   (contract last dims; rhs-transposed form)
    s = jax.lax.dot_general(k, q_big, (((1,), (1,)), ((), ())),
                            preferred_element_type=f32)            # (16, 128)
    s = s * SCALE + bias_ref[...]              # cross-batch columns -> -1e30

    # numerically-stable softmax over the 16-key (sublane) axis, exact division
    m = jnp.max(s, axis=0, keepdims=True)                          # (1, 128)
    e = jnp.exp(s - m)                                             # (16, 128)
    p = e / jnp.sum(e, axis=0, keepdims=True)                      # (16, 128)

    # ctx_big[r, d] = sum_j p[j, r] * v[j, d]   (lhs-contracted dot_general)
    ctx_big = jax.lax.dot_general(p, v, (((0,), (0,)), ((), ())),
                                  preferred_element_type=f32)      # (128, 32)

    # head combine: keep head-h columns of head-h rows, sum the 8 row blocks
    ctx = (ctx_big * head_mask).reshape(HEADS, ROWS, DIM).sum(axis=0)  # (16,32)

    # -- output projection -----------------------------------------------------
    y = jnp.dot(ctx, wout_ref[...], preferred_element_type=f32) + bout_ref[...]
    o_ref[...] = y.astype(o_ref.dtype)                             # (16, 32)


# ---------------- wrapper -----------------------------------------------------
def attention_pallas(x, w_qkv, w_out, b_out):
    b, n, dim = x.shape
    assert (b, n, dim) == (B, N, DIM)

    x2 = x.reshape(b * n, dim)                          # free XLA reshape

    # Compile-time-constant masks, built once outside the kernel (review item:
    # keep iota/compare filler off the kernel's critical path).
    r_idx = jnp.arange(BIG)                             # (head, row) pairs
    c_dim = jnp.arange(DIM)
    head_mask = ((r_idx[:, None] // ROWS) ==
                 (c_dim[None, :] // HEAD_DIM)).astype(jnp.float32)   # (128, 32)
    j_idx = jnp.arange(ROWS)                            # key rows
    same_batch = (j_idx[:, None] // N) == ((r_idx[None, :] % ROWS) // N)
    score_bias = jnp.where(same_batch, 0.0, NEG_BIG).astype(jnp.float32)  # (16,128)

    vmem = pl.BlockSpec(memory_space=pltpu.MemorySpace.VMEM)
    out = pl.pallas_call(
        attention_kernel,
        out_shape=jax.ShapeDtypeStruct((ROWS, DIM), x.dtype),
        in_specs=[vmem, vmem, vmem, vmem, vmem, vmem],
        out_specs=vmem,
    )(x2, w_qkv, w_out, b_out, head_mask, score_bias)

    return out.reshape(b, n, dim)


# ---------------- pure-JAX reference (for correctness check) -----------------
def attention_ref(x, w_qkv, w_out, b_out):
    b, n, dim = x.shape
    qkv = x @ w_qkv
    q, k, v = jnp.split(qkv, 3, axis=-1)

    def split_heads(t):                                  # (b,n,dim)->(b,h,n,d)
        return t.reshape(b, n, HEADS, HEAD_DIM).transpose(0, 2, 1, 3)

    q, k, v = map(split_heads, (q, k, v))
    dots = jnp.einsum('bhid,bhjd->bhij', q, k) * SCALE
    attn = jax.nn.softmax(dots, axis=-1)
    out = jnp.einsum('bhij,bhjd->bhid', attn, v)
    out = out.transpose(0, 2, 1, 3).reshape(b, n, dim)
    return out @ w_out + b_out


# ---------------- deterministic parameter init --------------------------------
def _std(init_scale, in_d, out_d):
    return (2.0 / (in_d + init_scale * out_d)) ** 0.5


def make_params(key):
    k1, k2 = jax.random.split(key, 2)
    # PyTorch to_qkv.weight shape (3*dim, dim) -> in_d=3*dim, out_d=dim
    std_qkv = _std(INIT_SCALE, 3 * DIM, DIM)
    # PyTorch to_out[0].weight shape (dim, dim)
    std_out = _std(INIT_SCALE, DIM, DIM)
    # stored transposed relative to torch so the kernel computes x @ W
    w_qkv = std_qkv * jax.random.normal(k1, (DIM, 3 * DIM), jnp.float32)
    w_out = std_out * jax.random.normal(k2, (DIM, DIM), jnp.float32)
    b_out = jnp.zeros((1, DIM), jnp.float32)              # module inits bias to 0
    return w_qkv, w_out, b_out


# ---------------- main ---------------------------------------------------------
if __name__ == "__main__":
    key = jax.random.PRNGKey(0)
    kx, kp = jax.random.split(key)
    x = jax.random.normal(kx, (B, N, DIM), jnp.float32)
    w_qkv, w_out, b_out = make_params(kp)

    out = attention_pallas(x, w_qkv, w_out, b_out)
    out = jax.block_until_ready(out)

    ref = attention_ref(x, w_qkv, w_out, b_out)
    assert out.shape == (B, N, DIM)
    # Tolerance covers the precision gap between XLA's default TPU matmuls
    # (bf16 operand passes) used by the reference and the kernel's f32 MXU
    # accumulation; the softmax itself uses exact division (no approx recip).
    assert jnp.allclose(out, ref, atol=3e-3, rtol=3e-3), "mismatch vs reference"

    print("KERNEL_OK")
</pallas_src>

<mosaic_0001>
module attributes {stable_mosaic.version = 11 : i64} {
  func.func @attention_kernel(%arg0: memref<16x32xf32, #tpu.memory_space<vmem>>, %arg1: memref<32x96xf32, #tpu.memory_space<vmem>>, %arg2: memref<32x32xf32, #tpu.memory_space<vmem>>, %arg3: memref<1x32xf32, #tpu.memory_space<vmem>>, %arg4: memref<128x32xf32, #tpu.memory_space<vmem>>, %arg5: memref<16x128xf32, #tpu.memory_space<vmem>>, %arg6: memref<16x32xf32, #tpu.memory_space<vmem>>) attributes {dimension_semantics = [], scalar_prefetch = 0 : i64, scratch_operands = 0 : i64, tpu.core_type = #tpu.core_type<tc>} {
    %c0 = arith.constant 0 : index
    %c0_0 = arith.constant 0 : index
    %0 = vector.load %arg0[%c0, %c0_0] : memref<16x32xf32, #tpu.memory_space<vmem>>, vector<16x32xf32>
    %c0_1 = arith.constant 0 : index
    %c0_2 = arith.constant 0 : index
    %1 = vector.load %arg1[%c0_1, %c0_2] : memref<32x96xf32, #tpu.memory_space<vmem>>, vector<32x96xf32>
    %cst = arith.constant dense<0.000000e+00> : vector<16x96xf32>
    %2 = tpu.matmul %0, %1, %cst {dimension_numbers = #tpu.dot_dimension_numbers<[1], [0], [0], [1], [0, 0, 1, 1], [], []>} : vector<16x32xf32>, vector<32x96xf32>, vector<16x96xf32> -> vector<16x96xf32>
    %3 = vector.extract_strided_slice %2 {offsets = [0, 0], sizes = [16, 32], strides = [1, 1]} : vector<16x96xf32> to vector<16x32xf32>
    %4 = vector.extract_strided_slice %2 {offsets = [0, 32], sizes = [16, 32], strides = [1, 1]} : vector<16x96xf32> to vector<16x32xf32>
    %5 = vector.extract_strided_slice %2 {offsets = [0, 64], sizes = [16, 32], strides = [1, 1]} : vector<16x96xf32> to vector<16x32xf32>
    %c0_3 = arith.constant 0 : index
    %c0_4 = arith.constant 0 : index
    %6 = vector.load %arg4[%c0_3, %c0_4] : memref<128x32xf32, #tpu.memory_space<vmem>>, vector<128x32xf32>
    %7 = vector.shape_cast %3 : vector<16x32xf32> to vector<1x16x32xf32>
    %8 = vector.shape_cast %7 : vector<1x16x32xf32> to vector<1x16x32xf32>
    %9 = vector.broadcast %8 : vector<1x16x32xf32> to vector<8x16x32xf32>
    %10 = vector.shape_cast %9 : vector<8x16x32xf32> to vector<128x32xf32>
    %11 = arith.mulf %10, %6 : vector<128x32xf32>
    %cst_5 = arith.constant dense<0.000000e+00> : vector<16x128xf32>
    %12 = tpu.matmul %4, %11, %cst_5 {dimension_numbers = #tpu.dot_dimension_numbers<[1], [1], [0], [0], [0, 0, 1, 0], [], []>} : vector<16x32xf32>, vector<128x32xf32>, vector<16x128xf32> -> vector<16x128xf32>
    %cst_6 = arith.constant 0.176776692 : f32
    %13 = vector.broadcast %cst_6 : f32 to vector<16x128xf32>
    %14 = arith.mulf %12, %13 : vector<16x128xf32>
    %c0_7 = arith.constant 0 : index
    %c0_8 = arith.constant 0 : index
    %15 = vector.load %arg5[%c0_7, %c0_8] : memref<16x128xf32, #tpu.memory_space<vmem>>, vector<16x128xf32>
    %16 = arith.addf %14, %15 : vector<16x128xf32>
    %cst_9 = arith.constant dense<0xFF800000> : vector<128xf32>
    %17 = vector.multi_reduction <maximumf>, %16, %cst_9 [0] : vector<16x128xf32> to vector<128xf32>
    %18 = vector.shape_cast %17 : vector<128xf32> to vector<1x128xf32>
    %19 = vector.broadcast %18 : vector<1x128xf32> to vector<16x128xf32>
    %20 = arith.subf %16, %19 : vector<16x128xf32>
    %21 = math.exp %20 : vector<16x128xf32>
    %cst_10 = arith.constant dense<0.000000e+00> : vector<128xf32>
    %22 = vector.multi_reduction <add>, %21, %cst_10 [0] : vector<16x128xf32> to vector<128xf32>
    %23 = vector.shape_cast %22 : vector<128xf32> to vector<1x128xf32>
    %24 = vector.broadcast %23 : vector<1x128xf32> to vector<16x128xf32>
    %25 = arith.divf %21, %24 : vector<16x128xf32>
    %cst_11 = arith.constant dense<0.000000e+00> : vector<128x32xf32>
    %26 = tpu.matmul %25, %5, %cst_11 {dimension_numbers = #tpu.dot_dimension_numbers<[0], [0], [1], [1], [0, 1, 1, 1], [], []>} : vector<16x128xf32>, vector<16x32xf32>, vector<128x32xf32> -> vector<128x32xf32>
    %27 = arith.mulf %26, %6 : vector<128x32xf32>
    %28 = vector.shape_cast %27 : vector<128x32xf32> to vector<8x16x32xf32>
    %cst_12 = arith.constant dense<0.000000e+00> : vector<16x32xf32>
    %29 = vector.multi_reduction <add>, %28, %cst_12 [0] : vector<8x16x32xf32> to vector<16x32xf32>
    %c0_13 = arith.constant 0 : index
    %c0_14 = arith.constant 0 : index
    %30 = vector.load %arg2[%c0_13, %c0_14] : memref<32x32xf32, #tpu.memory_space<vmem>>, vector<32x32xf32>
    %cst_15 = arith.constant dense<0.000000e+00> : vector<16x32xf32>
    %31 = tpu.matmul %29, %30, %cst_15 {dimension_numbers = #tpu.dot_dimension_numbers<[1], [0], [0], [1], [0, 0, 1, 1], [], []>} : vector<16x32xf32>, vector<32x32xf32>, vector<16x32xf32> -> vector<16x32xf32>
    %c0_16 = arith.constant 0 : index
    %c0_17 = arith.constant 0 : index
    %32 = vector.load %arg3[%c0_16, %c0_17] : memref<1x32xf32, #tpu.memory_space<vmem>>, vector<1x32xf32>
    %33 = vector.broadcast %32 : vector<1x32xf32> to vector<16x32xf32>
    %34 = arith.addf %31, %33 : vector<16x32xf32>
    %c0_18 = arith.constant 0 : index
    %c0_19 = arith.constant 0 : index
    %35 = vector.load %arg6[%c0_18, %c0_19] : memref<16x32xf32, #tpu.memory_space<vmem>>, vector<16x32xf32>
    tpu.vector_store %arg6[%c0_18, %c0_19], %34 {strides = array<i32>} : memref<16x32xf32, #tpu.memory_space<vmem>>, vector<16x32xf32>,
    return
  }
}

</mosaic_0001>

<bundles_post_ra>
// kernel: tpu_custom_call.1
= control target key start
LH: loop header
LB: loop body
LE: loop exit
PB: predicated region body
PF: predicated region fallthrough
CT: control target
= control target key end

     0   :  { %vm30_vm0 = vcmask 261120   ;;  %s1178_s0 = inlined_call_operand.vmem [shape: f32[16,32], index: 0, kind: input, shape index: {}]   ;;  %s1179_s1 = inlined_call_operand.vmem [shape: f32[32,96], index: 1, kind: input, shape index: {}]   ;;  %s1180_s2 = inlined_call_operand.vmem [shape: f32[32,32], index: 2, kind: input, shape index: {}]   ;;  %s1181_s3 = inlined_call_operand.vmem [shape: f32[1,32], index: 3, kind: input, shape index: {}]   ;;  %s1182_s4 = inlined_call_operand.vmem [shape: f32[128,32], index: 4, kind: input, shape index: {}]   ;;  %s1183_s5 = inlined_call_operand.vmem [shape: f32[16,128], index: 5, kind: input, shape index: {}]   ;;  %s1184_s6 = inlined_call_operand.hbm [shape: f32[16,32], index: 6, kind: output, shape index: {}]  }
   0x1   :  { %v29_v0 = vld [vmem:[%s1179_s1 + $0x18] sm:$0xff]  ;;  %v28_v1 = vld [vmem:[%s1179_s1 + $0x10] sm:$0xff]  ;;  %v24_v2 = vld [vmem:[%s1178_s0] sm:$0xff] }
   0x2   :  { %781 = vmatprep.subr.mxu0 %v29_v0  ;;  %v27_v3 = vld [vmem:[%s1179_s1 + $0x8] sm:$0xff]  ;;  %789 = vmatprep.mubr.msk.f32.mxu0 %vm30_vm0, %v24_v2 }
   0x3   :  { %782 = vmatpush3.msra.mxu0 %v29_v0 }
   0x4   :  { %11 = vsyncpa [#allocation3], 0  ;;  %783 = vmatprep.subr.mxu0 %v28_v1  ;;  %v26_v4 = vld [vmem:[%s1179_s1] sm:$0xff]  ;;  %v25_v5 = vld [vmem:[%s1178_s0 + $0x8] sm:$0xff]  ;;  %s900_s1 = smov 64   ;;  %s901_s0 = smov 96  }
   0x5   :  { %784 = vmatpush3.msra.mxu0 %v28_v1  ;;  %v963_v6 = vld [vmem:[%s1182_s4 + $0x78] sm:$0xff]  ;;  %v970_v8 = vld [vmem:[%s1182_s4 + $0x70] sm:$0xff]  ;;  %v981_v12 = vld [vmem:[%s1182_s4 + $0x68] sm:$0xff]  ;;  %vm344_vm1 = vcmask 130048   ;;  %s902_s26 = smov [#allocation2]  }
   0x6   :  { %785 = vmatprep.subr.mxu0 %v27_v3  ;;  %v991_v14 = vld [vmem:[%s1182_s4 + $0x60] sm:$0xff]  ;;  %v999_v16 = vld [vmem:[%s1182_s4 + $0x58] sm:$0xff]  ;;  %v1008_v18 = vld [vmem:[%s1182_s4 + $0x50] sm:$0xff]  ;;  %s683_s27 = sshll.u32 %s902_s26, 4  ;;  %s684_s27 = int_to_ptr.vmem [resolvable:$true] %s683_s27 }
   0x7   :  { %786 = vmatpush3.msra.mxu0 %v27_v3  ;;  %v1016_v20 = vld [vmem:[%s1182_s4 + $0x48] sm:$0xff]  ;;  %v1025_v22 = vld [vmem:[%s1182_s4 + $0x40] sm:$0xff]  ;;  %v1033_v24 = vld [vmem:[%s1182_s4 + $0x38] sm:$0xff]  ;;  %s878_s28 = scalar_lea.vmem %s684_s27, 256  ;;  %p883_p1 = scmp.lt.s32.totalorder %s684_s27, %s684_s27 }
   0x8   :  { %787 = vmatprep.subr.mxu0 %v26_v4  ;;  %v1042_v26 = vld [vmem:[%s1182_s4 + $0x30] sm:$0xff]  ;;  %v1050_v28 = vld [vmem:[%s1182_s4 + $0x28] sm:$0xff]  ;;  %v1059_v30 = vld [vmem:[%s1182_s4 + $0x20] sm:$0xff]  ;;  %p879_p0 = scmp.ne.s32.totalorder %s684_s27, %s878_s28  ;;  %p884_p2 = scmp.lt.s32.totalorder %s878_s28, %s878_s28 }
   0x9   :  { %788 = vmatpush3.msra.mxu0 %v26_v4  ;;  %v1067_v32 = vld [vmem:[%s1182_s4 + $0x18] sm:$0xff]  ;;  %v1076_v34 = vld [vmem:[%s1182_s4 + $0x10] sm:$0xff]  ;;  %v1084_v36 = vld [vmem:[%s1182_s4 + $0x8] sm:$0xff] }
   0xa   :  { %790 = vmatmul.mubr.msk.f32.vlgmr.msra.gmra.mxu0 %vm30_vm0, %v25_v5  ;;  %v1093_v38 = vld [vmem:[%s1182_s4] sm:$0xff]  ;;  %v280_v46 = vld [vmem:[%s1183_s5 + $0x8] sm:$0xff]  ;;  %p885_p3 = por %p884_p2, %p883_p1 }
   0xb   :  { %v279_v48 = vld [vmem:[%s1183_s5] sm:$0xff] }
   0xc   :  { %p886_p4 = pnand %p885_p3, %p879_p0 }
  0xca   :  { %v965_v7 = vpop.f32.mrf.mxu0 }
  0xcb   :  { %340 = vrot.lane.b32.xlu1 %v965_v7, %s900_s1  ;;  %v143_v9 = vmul.f32 %v965_v7, %v963_v6  ;;  %v141_v13 = vmul.f32 %v965_v7, %v981_v12  ;;  %v139_v17 = vmul.f32 %v965_v7, %v999_v16  ;;  %v137_v21 = vmul.f32 %v965_v7, %v1016_v20 }
  0xcc   :  { %v103_v10 = vpop.f32.mrf.mxu0  ;;  %v135_v25 = vmul.f32 %v965_v7, %v1033_v24  ;;  %v133_v29 = vmul.f32 %v965_v7, %v1050_v28  ;;  %v131_v33 = vmul.f32 %v965_v7, %v1067_v32  ;;  %v129_v37 = vmul.f32 %v965_v7, %v1084_v36 }
  0xcd   :  { %792 = vmatprep.subr.msk.mxu1 %vm30_vm0, %v143_v9  ;;  %146 = vrot.lane.b32.xlu0 %v103_v10, %s901_s0  ;;  %v142_v11 = vmul.f32 %v970_v8, %v103_v10  ;;  %v140_v15 = vmul.f32 %v991_v14, %v103_v10  ;;  %v138_v19 = vmul.f32 %v1008_v18, %v103_v10 }
  0xce   :  { %793 = vmatpush3.xpose.msk.msra.mxu1 %vm30_vm0, %v143_v9  ;;  %v136_v23 = vmul.f32 %v1025_v22, %v103_v10  ;;  %v134_v27 = vmul.f32 %v1042_v26, %v103_v10  ;;  %v132_v31 = vmul.f32 %v1059_v30, %v103_v10  ;;  %v130_v35 = vmul.f32 %v1076_v34, %v103_v10 }
  0xcf   :  { %338 = vrot.lane.b32.xlu1 %v103_v10, %s900_s1  ;;  %794 = vmatprep.subr.msk.mxu1 %vm30_vm0, %v142_v11  ;;  %v128_v39 = vmul.f32 %v1093_v38, %v103_v10 }
  0xd1   :  { %148 = vrot.lane.b32.xlu0 %v965_v7, %s901_s0 }
  0xd2   :  { %795 = vmatpush3.xpose.msk.msra.mxu1 %vm30_vm0, %v142_v11 }
  0xd3   :  { %796 = vmatprep.subr.msk.mxu1 %vm30_vm0, %v141_v13 }
  0xd6   :  { %797 = vmatpush3.xpose.msk.msra.mxu1 %vm30_vm0, %v141_v13 }
  0xd7   :  { %798 = vmatprep.subr.msk.mxu1 %vm30_vm0, %v140_v15 }
  0xda   :  { %799 = vmatpush3.xpose.msk.msra.mxu1 %vm30_vm0, %v140_v15 }
  0xdb   :  { %800 = vmatprep.subr.msk.mxu1 %vm30_vm0, %v139_v17 }
  0xde   :  { %801 = vmatpush3.xpose.msk.msra.mxu1 %vm30_vm0, %v139_v17 }
  0xdf   :  { %802 = vmatprep.subr.msk.mxu1 %vm30_vm0, %v138_v19 }
  0xe2   :  { %803 = vmatpush3.xpose.msk.msra.mxu1 %vm30_vm0, %v138_v19 }
  0xe3   :  { %804 = vmatprep.subr.msk.mxu1 %vm30_vm0, %v137_v21 }
  0xe6   :  { %805 = vmatpush3.xpose.msk.msra.mxu1 %vm30_vm0, %v137_v21 }
  0xe7   :  { %806 = vmatprep.subr.msk.mxu1 %vm30_vm0, %v136_v23 }
  0xea   :  { %807 = vmatpush3.xpose.msk.msra.mxu1 %vm30_vm0, %v136_v23 }
  0xeb   :  { %808 = vmatprep.subr.msk.mxu1 %vm30_vm0, %v135_v25 }
  0xee   :  { %809 = vmatpush3.xpose.msk.msra.mxu1 %vm30_vm0, %v135_v25 }
  0xef   :  { %810 = vmatprep.subr.msk.mxu1 %vm30_vm0, %v134_v27 }
  0xf2   :  { %811 = vmatpush3.xpose.msk.msra.mxu1 %vm30_vm0, %v134_v27 }
  0xf3   :  { %812 = vmatprep.subr.msk.mxu1 %vm30_vm0, %v133_v29 }
  0xf6   :  { %813 = vmatpush3.xpose.msk.msra.mxu1 %vm30_vm0, %v133_v29 }
  0xf7   :  { %814 = vmatprep.subr.msk.mxu1 %vm30_vm0, %v132_v31 }
  0xfa   :  { %815 = vmatpush3.xpose.msk.msra.mxu1 %vm30_vm0, %v132_v31 }
  0xfb   :  { %816 = vmatprep.subr.msk.mxu1 %vm30_vm0, %v131_v33 }
  0xfe   :  { %817 = vmatpush3.xpose.msk.msra.mxu1 %vm30_vm0, %v131_v33 }
  0xff   :  { %818 = vmatprep.subr.msk.mxu1 %vm30_vm0, %v130_v35 }
 0x102   :  { %819 = vmatpush3.xpose.msk.msra.mxu1 %vm30_vm0, %v130_v35 }
 0x103   :  { %820 = vmatprep.subr.msk.mxu1 %vm30_vm0, %v129_v37 }
 0x106   :  { %821 = vmatpush3.xpose.msk.msra.mxu1 %vm30_vm0, %v129_v37 }
 0x107   :  { %822 = vmatprep.subr.msk.mxu1 %vm30_vm0, %v128_v39 }
 0x10a   :  { %823 = vmatpush3.xpose.msk.msra.mxu1 %vm30_vm0, %v128_v39 }
 0x13d   :  { %v341_v40 = vpop.permute.xlu1 %340 }
 0x13e   :  { %827 = vmatprep.subr.mxu0 %v341_v40 }
 0x13f   :  { %828 = vmatpush3.msra.mxu0 %v341_v40  ;;  %v147_v41 = vpop.permute.xlu0 %146 }
 0x140   :  { %824 = vmatprep.mubr.msk.f32.mxu1 %vm30_vm0, %v147_v41 }
 0x141   :  { %v339_v42 = vpop.permute.xlu1 %338 }
 0x142   :  { %829 = vmatprep.subr.mxu0 %v339_v42 }
 0x143   :  { %830 = vmatpush3.msra.mxu0 %v339_v42  ;;  %v149_v43 = vpop.permute.xlu0 %148 }
 0x144   :  { %825 = vmatmul.mubr.msk.f32.vlgmr.msra.gmra.mxu1 %vm30_vm0, %v149_v43  ;;  %v587_v43 = vld [vmem:[%s1180_s2 + $0x18] sm:$0xff] }
 0x145   :  { %855 = vmatprep.subr.mxu0 %v587_v43 }
 0x204   :  { %v826_v44 = vpop.f32.mrf.mxu1 }
 0x205   :  { %v278_v45 = vmul.f32 0.17677669, %v826_v44  ;;  %v586_v44 = vld [vmem:[%s1180_s2 + $0x10] sm:$0xff] }
 0x206   :  { %v268_v47 = vpop.f32.mrf.mxu1 }
 0x207   :  { %v277_v49 = vmul.f32 0.17677669, %v268_v47  ;;  %v282_v50 = vadd.f32 %v280_v46, %v278_v45  ;;  %v585_v45 = vld [vmem:[%s1180_s2 + $0x8] sm:$0xff]  ;;  %v584_v46 = vld [vmem:[%s1180_s2] sm:$0xff] }
 0x209   :  { %v281_v51 = vadd.f32 %v279_v48, %v277_v49 }
 0x20b   :  { %v283_v52 = vmax.f32 %v281_v51, %v282_v50 }
 0x20d   :  { %v284_v53 = vrot.slane %v283_v52, 4 }
 0x20f   :  { %v285_v54 = vmax.f32 %v283_v52, %v284_v53 }
 0x211   :  { %v286_v55 = vrot.slane %v285_v54, 2 }
 0x213   :  { %v287_v56 = vmax.f32 %v285_v54, %v286_v55 }
 0x215   :  { %v288_v57 = vrot.slane %v287_v56, 1 }
 0x217   :  { %v289_v58 = vmax.f32 %v287_v56, %v288_v57 }
 0x219   :  { %v290_v59 = vsub.f32 %v281_v51, %v289_v58  ;;  %v291_v60 = vsub.f32 %v282_v50, %v289_v58 }
 0x21b   :  { %v292_v61 = vmul.f32 1.442695, %v290_v59  ;;  %v294_v62 = vmul.f32 1.442695, %v291_v60 }
 0x21d   :  { %872 = vpow2.f32 %v292_v61 }
 0x21e   :  { %874 = vpow2.f32 %v294_v62 }
 0x22a   :  { %v873_v63 = vpop.eup %872 }
 0x22b   :  { %v875_v0 = vpop.eup %874 }
 0x22c   :  { %v296_v1 = vadd.f32 %v875_v0, %v873_v63 }
 0x22e   :  { %v297_v2 = vrot.slane %v296_v1, 4 }
 0x230   :  { %v298_v3 = vadd.f32 %v297_v2, %v296_v1 }
 0x232   :  { %v299_v4 = vrot.slane %v298_v3, 2 }
 0x234   :  { %v300_v5 = vadd.f32 %v299_v4, %v298_v3 }
 0x236   :  { %v301_v7 = vrot.slane %v300_v5, 1 }
 0x238   :  { %v302_v9 = vadd.f32 %v301_v7, %v300_v5 }
 0x23a   :  { %876 = vrcp.f32 %v302_v9 }
 0x247   :  { %v877_v10 = vpop.eup %876 }
 0x248   :  { %v304_v11 = vmul.f32 %v877_v10, %v873_v63  ;;  %v305_v13 = vmul.f32 %v877_v10, %v875_v0 }
 0x24a   :  { %306 = vxpose.xlu0.b32.start [1/2] (short) %v304_v11, 128 }
 0x24e   :  { %307 = vxpose.xlu0.b32.end [2/2] (short) %v305_v13, 128 }
 0x2c6   :  { %v322_v15 = vpop.trf.xlu0 }
 0x2c7   :  { %831 = vmatprep.mubr.msk.f32.mxu0 %vm344_vm1, %v322_v15 }
 0x2ca   :  { %v323_v17 = vpop.trf.xlu0 }
 0x2cb   :  { %832 = vmatmul.mubr.msk.f32.vlgmr.msra.gmra.mxu0 %vm344_vm1, %v323_v17 }
 0x2cc   :  { %856 = vmatpush3.msra.mxu0 %v587_v43 }
 0x2cd   :  { %857 = vmatprep.subr.mxu0 %v586_v44 }
 0x2ce   :  { %v324_v19 = vpop.trf.xlu0  ;;  %858 = vmatpush3.msra.mxu0 %v586_v44 }
 0x2cf   :  { %834 = vmatprep.mubr.msk.f32.mxu0 %vm344_vm1, %v324_v19  ;;  %859 = vmatprep.subr.mxu0 %v585_v45 }
 0x2d0   :  { %860 = vmatpush3.msra.mxu0 %v585_v45 }
 0x2d1   :  { %861 = vmatprep.subr.mxu0 %v584_v46 }
 0x2d2   :  { %v325_v21 = vpop.trf.xlu0  ;;  %862 = vmatpush3.msra.mxu0 %v584_v46 }
 0x2d3   :  { %835 = vmatmul.mubr.msk.f32.gmra.mxu0 %vm344_vm1, %v325_v21 }
 0x2d6   :  { %v326_v23 = vpop.trf.xlu0 }
 0x2d7   :  { %837 = vmatprep.mubr.msk.f32.mxu0 %vm344_vm1, %v326_v23 }
 0x2da   :  { %v327_v25 = vpop.trf.xlu0 }
 0x2db   :  { %838 = vmatmul.mubr.msk.f32.gmra.mxu0 %vm344_vm1, %v327_v25 }
 0x2de   :  { %v328_v27 = vpop.trf.xlu0 }
 0x2df   :  { %840 = vmatprep.mubr.msk.f32.mxu0 %vm344_vm1, %v328_v27 }
 0x2e2   :  { %v329_v29 = vpop.trf.xlu0 }
 0x2e3   :  { %841 = vmatmul.mubr.msk.f32.gmra.mxu0 %vm344_vm1, %v329_v29 }
 0x2e6   :  { %v330_v31 = vpop.trf.xlu0 }
 0x2e7   :  { %843 = vmatprep.mubr.msk.f32.mxu0 %vm344_vm1, %v330_v31 }
 0x2ea   :  { %v331_v33 = vpop.trf.xlu0 }
 0x2eb   :  { %844 = vmatmul.mubr.msk.f32.gmra.mxu0 %vm344_vm1, %v331_v33 }
 0x2ee   :  { %v332_v35 = vpop.trf.xlu0 }
 0x2ef   :  { %846 = vmatprep.mubr.msk.f32.mxu0 %vm344_vm1, %v332_v35 }
 0x2f2   :  { %v333_v37 = vpop.trf.xlu0 }
 0x2f3   :  { %847 = vmatmul.mubr.msk.f32.gmra.mxu0 %vm344_vm1, %v333_v37 }
 0x2f6   :  { %v334_v39 = vpop.trf.xlu0 }
 0x2f7   :  { %849 = vmatprep.mubr.msk.f32.mxu0 %vm344_vm1, %v334_v39 }
 0x2fa   :  { %v335_v40 = vpop.trf.xlu0 }
 0x2fb   :  { %850 = vmatmul.mubr.msk.f32.gmra.mxu0 %vm344_vm1, %v335_v40 }
 0x2fe   :  { %v336_v41 = vpop.trf.xlu0 }
 0x2ff   :  { %852 = vmatprep.mubr.msk.f32.mxu0 %vm344_vm1, %v336_v41 }
 0x302   :  { %v337_v42 = vpop.trf.xlu0 }
 0x303   :  { %853 = vmatmul.mubr.msk.f32.gmra.mxu0 %vm344_vm1, %v337_v42 }
 0x38b   :  { %v833_v47 = vpop.f32.mrf.mxu0 }
 0x38c   :  { %v539_v62 = vmul.f32 %v833_v47, %v1084_v36 }
 0x38d   :  { %v459_v48 = vpop.f32.mrf.mxu0 }
 0x38e   :  { %v538_v60 = vmul.f32 %v459_v48, %v1093_v38  ;;  %v569_v36 = vsel %vm30_vm0, %v539_v62, 0.0 }
 0x393   :  { %v836_v49 = vpop.f32.mrf.mxu0 }
 0x394   :  { %v541_v59 = vmul.f32 %v836_v49, %v1067_v32  ;;  %v554_v32 = vsel %vm30_vm0, %v538_v60, 0.0 }
 0x395   :  { %v469_v50 = vpop.f32.mrf.mxu0 }
 0x396   :  { %v540_v58 = vmul.f32 %v469_v50, %v1076_v34  ;;  %v570_v3 = vsel %vm30_vm0, %v541_v59, 0.0 }
 0x398   :  { %v555_v1 = vsel %vm30_vm0, %v540_v58, 0.0 }
 0x399   :  { %v556_v5 = vadd.f32 %v555_v1, %v554_v32 }
 0x39b   :  { %v839_v51 = vpop.f32.mrf.mxu0 }
 0x39c   :  { %v543_v63 = vmul.f32 %v839_v51, %v1050_v28 }
 0x39d   :  { %v479_v52 = vpop.f32.mrf.mxu0 }
 0x39e   :  { %v542_v61 = vmul.f32 %v479_v52, %v1059_v30  ;;  %v572_v28 = vsel %vm30_vm0, %v543_v63, 0.0 }
 0x3a0   :  { %v557_v38 = vsel %vm30_vm0, %v542_v61, 0.0 }
 0x3a1   :  { %v558_v11 = vadd.f32 %v557_v38, %v556_v5 }
 0x3a3   :  { %v842_v53 = vpop.f32.mrf.mxu0 }
 0x3a4   :  { %v545_v4 = vmul.f32 %v842_v53, %v1033_v24 }
 0x3a5   :  { %v489_v54 = vpop.f32.mrf.mxu0 }
 0x3a6   :  { %v544_v2 = vmul.f32 %v489_v54, %v1042_v26  ;;  %v571_v26 = vadd.f32 %v570_v3, %v569_v36  ;;  %v574_v13 = vsel %vm30_vm0, %v545_v4, 0.0 }
 0x3a8   :  { %v559_v10 = vsel %vm30_vm0, %v544_v2, 0.0  ;;  %v573_v17 = vadd.f32 %v572_v28, %v571_v26 }
 0x3a9   :  { %v560_v21 = vadd.f32 %v559_v10, %v558_v11 }
 0x3aa   :  { %v575_v25 = vadd.f32 %v574_v13, %v573_v17 }
 0x3ab   :  { %v845_v55 = vpop.f32.mrf.mxu0 }
 0x3ac   :  { %v547_v7 = vmul.f32 %v845_v55, %v1016_v20 }
 0x3ad   :  { %v499_v56 = vpop.f32.mrf.mxu0 }
 0x3ae   :  { %v546_v30 = vmul.f32 %v499_v56, %v1025_v22  ;;  %v576_v23 = vsel %vm30_vm0, %v547_v7, 0.0 }
 0x3af   :  { %v577_v33 = vadd.f32 %v576_v23, %v575_v25 }
 0x3b0   :  { %v561_v22 = vsel %vm30_vm0, %v546_v30, 0.0 }
 0x3b1   :  { %v562_v29 = vadd.f32 %v561_v22, %v560_v21 }
 0x3b3   :  { %v848_v57 = vpop.f32.mrf.mxu0 }
 0x3b4   :  { %v549_v15 = vmul.f32 %v848_v57, %v999_v16 }
 0x3b5   :  { %v509_v0 = vpop.f32.mrf.mxu0 }
 0x3b6   :  { %v548_v24 = vmul.f32 %v509_v0, %v1008_v18  ;;  %v578_v18 = vsel %vm30_vm0, %v549_v15, 0.0 }
 0x3b7   :  { %v579_v40 = vadd.f32 %v578_v18, %v577_v33 }
 0x3b8   :  { %v563_v27 = vsel %vm30_vm0, %v548_v24, 0.0 }
 0x3b9   :  { %v564_v37 = vadd.f32 %v563_v27, %v562_v29 }
 0x3bb   :  { %v851_v34 = vpop.f32.mrf.mxu0 }
 0x3bc   :  { %v551_v20 = vmul.f32 %v851_v34, %v981_v12 }
 0x3bd   :  { %v519_v9 = vpop.f32.mrf.mxu0 }
 0x3be   :  { %v550_v19 = vmul.f32 %v519_v9, %v991_v14  ;;  %v580_v14 = vsel %vm30_vm0, %v551_v20, 0.0 }
 0x3bf   :  { %v581_v43 = vadd.f32 %v580_v14, %v579_v40 }
 0x3c0   :  { %v565_v16 = vsel %vm30_vm0, %v550_v19, 0.0 }
 0x3c1   :  { %v566_v12 = vadd.f32 %v565_v16, %v564_v37 }
 0x3c3   :  { %v854_v31 = vpop.f32.mrf.mxu0 }
 0x3c4   :  { %v553_v35 = vmul.f32 %v854_v31, %v963_v6  ;;  %v730_v6 = vld [vmem:[%s1181_s3] ss:$0 sm:$0xff] }
 0x3c5   :  { %v529_v39 = vpop.f32.mrf.mxu0 }
 0x3c6   :  { %v552_v41 = vmul.f32 %v529_v39, %v970_v8  ;;  %v582_v42 = vsel %vm30_vm0, %v553_v35, 0.0 }
 0x3c7   :  { %v583_v46 = vadd.f32 %v582_v42, %v581_v43 }
 0x3c8   :  { %v567_v44 = vsel %vm30_vm0, %v552_v41, 0.0 }
 0x3c9   :  { %v568_v45 = vadd.f32 %v567_v44, %v566_v12 }
 0x3cb   :  { %863 = vmatprep.mubr.msk.f32.mxu0 %vm30_vm0, %v568_v45 }
 0x3cc   :  { %864 = vmatmul.mubr.msk.f32.vlgmr.msra.gmra.mxu0 %vm30_vm0, %v583_v46 }
 0x48c   :  { %v865_v47 = vpop.f32.mrf.mxu0 }
 0x48d   :  { %v673_v8 = vadd.f32 %v865_v47, %v730_v6 }
 0x48e   :  { %v667_v48 = vpop.f32.mrf.mxu0 }
 0x48f   :  { %677 = vst.msk [vmem:[#allocation2 + $0x8] sm:$0xff] %vm30_vm0, %v673_v8  ;;  %v668_v49 = vadd.f32 %v730_v6, %v667_v48 }
 0x491   :  { %676 = vst.msk [vmem:[#allocation2] sm:$0xff] %vm30_vm0, %v668_v49 }
 0x492   :  { %889 = shalt.err (!%p886_p4)
}
 0x493   :  { %s903_s29 = smov 128   ;;  %s904_s3 = smov 8  }
 0x494   :  { %689 = dma.vmem_to_hbm [thread:$0]  %s684_s27, 256, %s1184_s6, [#allocation3], %s903_s29, %s903_s29, %s904_s3  }
 0x495   :  { %898 = dma.done.wait [#allocation3], 256  }
 0x496   :  { %899 = vsyncadd [#allocation3], 4294967040 }
 0x497   :  { %693 = vsyncpa [#allocation3], 1 }

</bundles_post_ra>
